<compile_context>
chip_gen: v6e
topology: v6e:2x2x1
jax: 0.10.0
libtpu: 0.0.40
codegen_flags: <defaults>
</compile_context>

<pallas_src>
import math

import jax
import jax.numpy as jnp
import numpy as np
from jax import lax
from jax.experimental import pallas as pl
from jax.experimental.pallas import tpu as pltpu

_LANE = 128


# ----------------------------- kernels --------------------------------------


def gcn_chain_kernel(inp_ref, adj_ref, w1_ref, w2_ref, x_ref, h_ref):
    """Batch-independent GCN chain, tiled over output (Cf) columns."""

    @pl.when(pl.program_id(0) == 0)
    def _():
        h = jnp.dot(inp_ref[...], w1_ref[...], preferred_element_type=jnp.float32)
        h = jnp.dot(adj_ref[...], h, preferred_element_type=jnp.float32)
        h_ref[...] = jnp.maximum(h, 0.2 * h)            # LeakyReLU(0.2)

    g = jnp.dot(h_ref[...], w2_ref[...], preferred_element_type=jnp.float32)
    x_ref[...] = jnp.dot(adj_ref[...], g, preferred_element_type=jnp.float32)


def pool_matmul_kernel(feat_ref, x_ref, out_ref):
    """Global spatial max-pool of one (bt, cf_t, H*W) feature block, then
    accumulate pooled @ x[:, cf_slice]^T into the resident (bt, C_pad) output."""
    cf_step = pl.program_id(1)
    cf_t = feat_ref.shape[1]

    @pl.when(cf_step == 0)
    def _init():
        out_ref[...] = jnp.zeros_like(out_ref)

    # MaxPool2d(14,14) over a 14x14 map == global spatial max (lane reduction),
    # done in the feature's native dtype (bf16 streams at half the HBM bytes).
    pooled = jnp.max(feat_ref[...], axis=-1)             # (bt, cf_t)

    # x is fully resident in VMEM; slice this step's Cf columns out of it.
    if x_ref.shape[1] == cf_t:
        x_tile = x_ref[...]
    else:
        start = pl.multiple_of(cf_step * cf_t, cf_t)     # cf_t % 128 == 0 here
        x_tile = x_ref[:, pl.ds(start, cf_t)]            # (C_pad, cf_t)

    # pooled @ x_tile^T without materializing a transpose: contract on Cf.
    # bf16 x bf16 operands take the bf16 MXU path with f32 accumulation.
    out_ref[...] += lax.dot_general(
        pooled, x_tile,
        dimension_numbers=(((1,), (1,)), ((), ())),
        preferred_element_type=jnp.float32)


# ----------------------------- helpers ---------------------------------------


def gen_adj(A):
    # torch: D = diag(A.sum(1) ** -0.5); adj = (A @ D).T @ D
    D = jnp.power(jnp.sum(A, axis=1), -0.5)
    return (A * D[None, :]).T * D[None, :]


def _round_up(x, m):
    return ((x + m - 1) // m) * m


def _vmem_capacity_bytes():
    try:
        info = pltpu.get_tpu_info()
        for name in ("vmem_capacity_bytes", "vmem_size_bytes", "vmem_bytes"):
            cap = getattr(info, name, None)
            if cap:
                return int(cap)
    except Exception:
        pass
    return None


def _kernel_b_budgets():
    """(per-buffer feature-block budget, scoped VMEM cap) per chip class."""
    cap = _vmem_capacity_bytes()
    if cap is None:
        return 4 << 20, 32 << 20                    # unknown chip: conservative
    if cap <= 96 << 20:                             # v7x-class: 64 MiB physical
        per_buf, scoped = 6 << 20, 48 << 20
    else:                                           # v5e / v6e: 128 MiB physical
        per_buf, scoped = 8 << 20, 64 << 20
    scoped = min(scoped, max(cap - (8 << 20), 16 << 20))
    return per_buf, scoped


def _pick_batch_tile(B, max_bt=32):
    """Largest divisor of B that is <= max_bt and leaves >= 2 batch tiles, so
    the 'parallel' batch axis can shard across both v7x TensorCores."""
    if B <= 1:
        return max(B, 1)
    best = 1
    top = min(B // 2, max_bt)
    for bt in range(1, top + 1):
        if B % bt == 0:
            best = bt
    return best


def _pick_cf_tile(Cf, bt, hw, feat_itemsize, fixed_bytes, per_buf_budget, vmem_cap):
    """Largest multiple-of-128 divisor of Cf such that the double-buffered,
    LANE-PADDED feature block plus the resident x / output blocks fit."""
    hw_pad = _round_up(hw, _LANE)                    # 196 -> 256 lanes in VMEM

    def fits(cf_t):
        feat_buf = bt * cf_t * hw_pad * feat_itemsize
        return (feat_buf <= per_buf_budget
                and 2 * feat_buf + fixed_bytes <= vmem_cap)

    if Cf % _LANE != 0:
        return Cf                                    # small / odd Cf: one tile
    best = _LANE
    t = _LANE
    while t <= Cf:
        if Cf % t == 0 and fits(t):
            best = t
        t += _LANE
    return best


def _pick_gcn_col_tile(Cf, H1, max_w2_tile_bytes=2 << 20):
    """Cf-column tile for Kernel A: keep the w2 block around <= 2 MiB so the
    chain fits v5e's 16 MiB default scoped VMEM even with double buffering."""
    if Cf % _LANE != 0:
        return Cf
    best = _LANE
    t = _LANE
    while t <= Cf:
        if Cf % t == 0 and H1 * t * 4 <= max_w2_tile_bytes:
            best = t
        t += _LANE
    return best


# ----------------------------- wrapper ---------------------------------------


def mlgcn_head(feature_nchw, inp, A, w1, w2, *, batch_tile=None, cf_tile=None):
    """feature_nchw: (B, Cf, 14, 14) backbone feature map (any float dtype);
    inp: (1, C, Cin) label embeddings; A: (C, C); w1: (Cin, H1); w2: (H1, Cf)."""
    B, Cf, H, W = feature_nchw.shape
    if (H, W) != (14, 14):
        # MaxPool2d(14,14) == global spatial max only holds for 14x14 maps.
        raise ValueError("MLGCN head expects a 14x14 backbone feature map")
    HW = H * W

    inp0 = inp[0].astype(jnp.float32)                # forward does inp = inp[0]
    C, Cin = inp0.shape
    H1 = w1.shape[1]
    assert w2.shape == (H1, Cf)

    # Keep the backbone dtype for the big HBM stream (no f32 upcast here).
    feat3d = feature_nchw.reshape(B, Cf, HW)
    feat_dtype = feat3d.dtype

    adj = gen_adj(A.astype(jnp.float32))             # gen_adj(self.A).detach()

    # Pad classes to a lane-dense multiple of 128. Zero rows/cols of adj/inp
    # stay exactly zero through the GCN chain, so padded outputs are 0.
    C_pad = _round_up(C, _LANE)
    adj_p = jnp.pad(adj, ((0, C_pad - C), (0, C_pad - C)))
    inp_p = jnp.pad(inp0, ((0, C_pad - C), (0, 0)))

    # --- Kernel A: batch-independent GCN chain, computed once. ----------------
    cf_a = _pick_gcn_col_tile(Cf, H1)
    x = pl.pallas_call(
        gcn_chain_kernel,
        out_shape=jax.ShapeDtypeStruct((C_pad, Cf), jnp.float32),
        grid=(Cf // cf_a,),
        in_specs=[
            pl.BlockSpec((C_pad, Cin), lambda j: (0, 0)),
            pl.BlockSpec((C_pad, C_pad), lambda j: (0, 0)),
            pl.BlockSpec((Cin, H1), lambda j: (0, 0)),
            pl.BlockSpec((H1, cf_a), lambda j: (0, j)),
        ],
        out_specs=pl.BlockSpec((C_pad, cf_a), lambda j: (0, j)),
        scratch_shapes=[pltpu.VMEM((C_pad, H1), jnp.float32)],
        compiler_params=pltpu.CompilerParams(
            dimension_semantics=("arbitrary",)),     # scratch h carried across
    )(inp_p, adj_p, w1.astype(jnp.float32), w2.astype(jnp.float32))

    # bf16 features -> bf16 x so the pooled @ x^T matmul takes the bf16 MXU
    # path with f32 accumulation; f32 features keep x in f32.
    x_b = x if feat_dtype == jnp.dtype(jnp.float32) else x.astype(feat_dtype)

    # --- Kernel B: streamed pooling + final matmul (pure HBM-stream bound). ---
    bt = batch_tile if batch_tile is not None else _pick_batch_tile(B)
    assert B % bt == 0, "batch tile must divide batch"

    x_bytes = C_pad * Cf * x_b.dtype.itemsize
    out_block_bytes = bt * C_pad * 4
    fixed_bytes = 2 * x_bytes + 2 * out_block_bytes + (2 << 20)   # + headroom
    per_buf_budget, vmem_cap = _kernel_b_budgets()

    cf_t = cf_tile if cf_tile is not None else _pick_cf_tile(
        Cf, bt, HW, feat_dtype.itemsize, fixed_bytes, per_buf_budget, vmem_cap)
    assert Cf % cf_t == 0, "Cf tile must divide Cf"
    assert cf_t == Cf or cf_t % _LANE == 0, "Cf tile must be lane-aligned"

    hw_pad = _round_up(HW, _LANE)                     # 196 -> 256 lanes in VMEM
    feat_buf_bytes = bt * cf_t * hw_pad * feat_dtype.itemsize
    vmem_limit = int(min(
        vmem_cap,
        max(32 << 20, 2 * feat_buf_bytes + fixed_bytes + (2 << 20))))

    cost = pl.CostEstimate(
        flops=int(2 * B * C_pad * Cf + B * Cf * HW),
        transcendentals=0,
        bytes_accessed=int(B * Cf * HW * feat_dtype.itemsize
                           + x_bytes + B * C_pad * 4))

    grid = (B // bt, Cf // cf_t)

    out_p = pl.pallas_call(
        pool_matmul_kernel,
        out_shape=jax.ShapeDtypeStruct((B, C_pad), jnp.float32),
        grid=grid,
        in_specs=[
            pl.BlockSpec((bt, cf_t, HW), lambda b, c: (b, c, 0)),
            # x is ~1 MB at production sizes: DMA once, keep fully resident.
            pl.BlockSpec((C_pad, Cf), lambda b, c: (0, 0)),
        ],
        out_specs=pl.BlockSpec((bt, C_pad), lambda b, c: (b, 0)),
        compiler_params=pltpu.CompilerParams(
            dimension_semantics=("parallel", "arbitrary"),
            vmem_limit_bytes=vmem_limit),
        cost_estimate=cost,
    )(feat3d, x_b)

    return out_p[:, :C]


# ----------------------------- reference -------------------------------------


def reference(feature_nchw, inp, A, w1, w2):
    B, Cf, H, W = feature_nchw.shape
    pooled = jnp.max(
        feature_nchw.reshape(B, Cf, H * W).astype(jnp.float32), axis=-1)
    adj = gen_adj(A.astype(jnp.float32))
    x = adj @ (inp[0].astype(jnp.float32) @ w1)
    x = jnp.maximum(x, 0.2 * x)
    x = adj @ (x @ w2)
    return pooled @ x.T


# ----------------------------- test ------------------------------------------


if __name__ == "__main__":
    # Small, module-consistent shapes (stand-ins for B, 2048, 14, 14 / 80 / 300 / 1024).
    B = 16          # batch  -> >=2 batch tiles (v7x dual-TC requirement)
    Cf = 256        # backbone feature channels
    H = W = 14      # backbone spatial extent (MaxPool2d(14,14) window)
    C = 8           # num_classes
    Cin = 32        # label-embedding dim
    H1 = 64         # gc1 output dim

    key = jax.random.PRNGKey(0)
    k_feat, k_inp, k_a, k_w1, k_w2 = jax.random.split(key, 5)

    feature = jax.random.normal(k_feat, (B, Cf, H, W), dtype=jnp.float32)
    inp = jax.random.normal(k_inp, (1, C, Cin), dtype=jnp.float32)

    # Deterministic synthetic A (gen_A reads a pickle file; built in-script):
    raw = jax.random.uniform(k_a, (C, C), dtype=jnp.float32)
    binA = (raw >= 0.5).astype(jnp.float32)
    A = binA * 0.25 / (jnp.sum(binA, axis=0, keepdims=True) + 1e-6) + jnp.eye(
        C, dtype=jnp.float32)

    # GraphConvolution weights: uniform(-stdv, stdv), stdv = 1/sqrt(out_features).
    stdv1 = 1.0 / math.sqrt(H1)
    w1 = jax.random.uniform(k_w1, (Cin, H1), minval=-stdv1, maxval=stdv1,
                            dtype=jnp.float32)
    stdv2 = 1.0 / math.sqrt(Cf)
    w2 = jax.random.uniform(k_w2, (H1, Cf), minval=-stdv2, maxval=stdv2,
                            dtype=jnp.float32)

    ref = jax.block_until_ready(reference(feature, inp, A, w1, w2))

    # 1) f32 path, auto (generation-aware) tiling.
    out = jax.block_until_ready(mlgcn_head(feature, inp, A, w1, w2))
    assert out.shape == (B, C), out.shape
    np.testing.assert_allclose(np.asarray(out), np.asarray(ref),
                               rtol=1e-5, atol=1e-4)

    # 2) f32 path, explicit small tiles -> grid (2, 2), exercises the Cf-axis
    #    init + accumulate contract and the resident-x column slicing.
    out_t = jax.block_until_ready(
        mlgcn_head(feature, inp, A, w1, w2, batch_tile=8, cf_tile=128))
    np.testing.assert_allclose(np.asarray(out_t), np.asarray(ref),
                               rtol=1e-5, atol=1e-4)

    # 3) All-negative features: the 196 -> 256 lane padding must not win the max.
    feat_neg = feature - 100.0
    out_neg = jax.block_until_ready(
        mlgcn_head(feat_neg, inp, A, w1, w2, batch_tile=8, cf_tile=128))
    ref_neg = jax.block_until_ready(reference(feat_neg, inp, A, w1, w2))
    np.testing.assert_allclose(np.asarray(out_neg), np.asarray(ref_neg),
                               rtol=1e-5, atol=1e-4)

    # 4) bf16 feature stream (half the HBM bytes, bf16 MXU with f32 acc).
    feat_bf16 = feature.astype(jnp.bfloat16)
    out_bf16 = jax.block_until_ready(mlgcn_head(feat_bf16, inp, A, w1, w2))
    ref_bf16 = jax.block_until_ready(
        reference(feat_bf16.astype(jnp.float32).reshape(B, Cf, H, W),
                  inp, A, w1, w2))
    np.testing.assert_allclose(np.asarray(out_bf16), np.asarray(ref_bf16),
                               rtol=3e-2, atol=3e-2)

    print("KERNEL_OK")
</pallas_src>

<mosaic_0001>
module attributes {stable_mosaic.version = 11 : i64} {
  func.func @gcn_chain_kernel(%arg0: i32, %arg1: memref<128x32xf32, #tpu.memory_space<vmem>>, %arg2: memref<128x128xf32, #tpu.memory_space<vmem>>, %arg3: memref<32x64xf32, #tpu.memory_space<vmem>>, %arg4: memref<64x256xf32, #tpu.memory_space<vmem>>, %arg5: memref<128x256xf32, #tpu.memory_space<vmem>>, %arg6: memref<128x64xf32, #tpu.memory_space<vmem>>) attributes {dimension_semantics = [#tpu.dimension_semantics<arbitrary>], iteration_bounds = array<i64: 1>, scalar_prefetch = 0 : i64, scratch_operands = 1 : i64, tpu.core_type = #tpu.core_type<tc>, window_params = [{pipeline_mode = #tpu.pipeline_mode<synchronous>, transform_indices = @transform_0, window_bounds = array<i64: 128, 32>}, {pipeline_mode = #tpu.pipeline_mode<synchronous>, transform_indices = @transform_1, window_bounds = array<i64: 128, 128>}, {pipeline_mode = #tpu.pipeline_mode<synchronous>, transform_indices = @transform_2, window_bounds = array<i64: 32, 64>}, {transform_indices = @transform_3, window_bounds = array<i64: 64, 256>}, {transform_indices = @transform_4, window_bounds = array<i64: 128, 256>}]} {
    %c0_i32 = arith.constant 0 : i32
    %0 = arith.cmpi eq, %arg0, %c0_i32 : i32
    %1 = arith.extui %0 : i1 to i32
    %c0_i32_0 = arith.constant 0 : i32
    %2 = arith.cmpi ne, %1, %c0_i32_0 : i32
    scf.if %2 {
      %c0_9 = arith.constant 0 : index
      %c0_10 = arith.constant 0 : index
      %9 = vector.load %arg1[%c0_9, %c0_10] : memref<128x32xf32, #tpu.memory_space<vmem>>, vector<128x32xf32>
      %c0_11 = arith.constant 0 : index
      %c0_12 = arith.constant 0 : index
      %10 = vector.load %arg3[%c0_11, %c0_12] : memref<32x64xf32, #tpu.memory_space<vmem>>, vector<32x64xf32>
      %cst_13 = arith.constant dense<0.000000e+00> : vector<128x64xf32>
      %11 = tpu.matmul %9, %10, %cst_13 {dimension_numbers = #tpu.dot_dimension_numbers<[1], [0], [0], [1], [0, 0, 1, 1], [], []>} : vector<128x32xf32>, vector<32x64xf32>, vector<128x64xf32> -> vector<128x64xf32>
      %c0_14 = arith.constant 0 : index
      %c0_15 = arith.constant 0 : index
      %12 = vector.load %arg2[%c0_14, %c0_15] : memref<128x128xf32, #tpu.memory_space<vmem>>, vector<128x128xf32>
      %cst_16 = arith.constant dense<0.000000e+00> : vector<128x64xf32>
      %13 = tpu.matmul %12, %11, %cst_16 {dimension_numbers = #tpu.dot_dimension_numbers<[1], [0], [0], [1], [0, 0, 1, 1], [], []>} : vector<128x128xf32>, vector<128x64xf32>, vector<128x64xf32> -> vector<128x64xf32>
      %cst_17 = arith.constant 2.000000e-01 : f32
      %14 = vector.broadcast %cst_17 : f32 to vector<128x64xf32>
      %15 = arith.mulf %14, %13 : vector<128x64xf32>
      %16 = arith.maximumf %13, %15 : vector<128x64xf32>
      %c0_18 = arith.constant 0 : index
      %c0_19 = arith.constant 0 : index
      %17 = vector.load %arg6[%c0_18, %c0_19] : memref<128x64xf32, #tpu.memory_space<vmem>>, vector<128x64xf32>
      tpu.vector_store %arg6[%c0_18, %c0_19], %16 {strides = array<i32>} : memref<128x64xf32, #tpu.memory_space<vmem>>, vector<128x64xf32>,
    } else {
    }
    %c0 = arith.constant 0 : index
    %c0_1 = arith.constant 0 : index
    %3 = vector.load %arg6[%c0, %c0_1] : memref<128x64xf32, #tpu.memory_space<vmem>>, vector<128x64xf32>
    %c0_2 = arith.constant 0 : index
    %c0_3 = arith.constant 0 : index
    %4 = vector.load %arg4[%c0_2, %c0_3] : memref<64x256xf32, #tpu.memory_space<vmem>>, vector<64x256xf32>
    %cst = arith.constant dense<0.000000e+00> : vector<128x256xf32>
    %5 = tpu.matmul %3, %4, %cst {dimension_numbers = #tpu.dot_dimension_numbers<[1], [0], [0], [1], [0, 0, 1, 1], [], []>} : vector<128x64xf32>, vector<64x256xf32>, vector<128x256xf32> -> vector<128x256xf32>
    %c0_4 = arith.constant 0 : index
    %c0_5 = arith.constant 0 : index
    %6 = vector.load %arg2[%c0_4, %c0_5] : memref<128x128xf32, #tpu.memory_space<vmem>>, vector<128x128xf32>
    %cst_6 = arith.constant dense<0.000000e+00> : vector<128x256xf32>
    %7 = tpu.matmul %6, %5, %cst_6 {dimension_numbers = #tpu.dot_dimension_numbers<[1], [0], [0], [1], [0, 0, 1, 1], [], []>} : vector<128x128xf32>, vector<128x256xf32>, vector<128x256xf32> -> vector<128x256xf32>
    %c0_7 = arith.constant 0 : index
    %c0_8 = arith.constant 0 : index
    %8 = vector.load %arg5[%c0_7, %c0_8] : memref<128x256xf32, #tpu.memory_space<vmem>>, vector<128x256xf32>
    tpu.vector_store %arg5[%c0_7, %c0_8], %7 {strides = array<i32>} : memref<128x256xf32, #tpu.memory_space<vmem>>, vector<128x256xf32>,
    return
  }
  func.func @transform_0(%arg0: i32) -> (i32, i32) {
    %c0_i32 = arith.constant 0 : i32
    %c0_i32_0 = arith.constant 0 : i32
    %c0_i32_1 = arith.constant 0 : i32
    return %c0_i32, %c0_i32_0 : i32, i32
  }
  func.func @transform_1(%arg0: i32) -> (i32, i32) {
    %c0_i32 = arith.constant 0 : i32
    %c0_i32_0 = arith.constant 0 : i32
    %c0_i32_1 = arith.constant 0 : i32
    return %c0_i32, %c0_i32_0 : i32, i32
  }
  func.func @transform_2(%arg0: i32) -> (i32, i32) {
    %c0_i32 = arith.constant 0 : i32
    %c0_i32_0 = arith.constant 0 : i32
    %c0_i32_1 = arith.constant 0 : i32
    return %c0_i32, %c0_i32_0 : i32, i32
  }
  func.func @transform_3(%arg0: i32) -> (i32, i32) {
    %c0_i32 = arith.constant 0 : i32
    %c0_i32_0 = arith.constant 0 : i32
    return %c0_i32, %arg0 : i32, i32
  }
  func.func @transform_4(%arg0: i32) -> (i32, i32) {
    %c0_i32 = arith.constant 0 : i32
    %c0_i32_0 = arith.constant 0 : i32
    return %c0_i32, %arg0 : i32, i32
  }
}

</mosaic_0001>

<bundles_post_ra>
// kernel: tpu_custom_call.1
= control target key start
LH: loop header
LB: loop body
LE: loop exit
PB: predicated region body
PF: predicated region fallthrough
CT: control target
= control target key end

     0   :  { %9 = vsyncpa [#allocation4], 0  ;;  %s1519_s0 = inlined_call_operand.vmem [shape: f32[128,32], index: 0, kind: input, shape index: {}]   ;;  %s1520_s1 = inlined_call_operand.vmem [shape: f32[128,128], index: 1, kind: input, shape index: {}]   ;;  %s1521_s2 = inlined_call_operand.vmem [shape: f32[32,64], index: 2, kind: input, shape index: {}]   ;;  %s1522_s3 = inlined_call_operand.hbm [shape: f32[64,256], index: 3, kind: input, shape index: {}]   ;;  %s1523_s4 = inlined_call_operand.hbm [shape: f32[128,256], index: 4, kind: output, shape index: {}]  }
   0x1   :  { %10 = vsyncpa [#allocation5], 0  ;;  %s1181_s15 = smov [#allocation3]  }
   0x2   :  { %s22_s16 = sshll.u32 %s1181_s15, 4  ;;  %s23_s16 = int_to_ptr.vmem [resolvable:$true] %s22_s16 }
   0x3   :  { %s1145_s17 = scalar_lea.vmem %s23_s16, 2048  ;;  %p1150_p1 = scmp.lt.s32.totalorder %s23_s16, %s23_s16 }
   0x4   :  { %p1146_p0 = scmp.ne.s32.totalorder %s23_s16, %s1145_s17  ;;  %p1151_p2 = scmp.lt.s32.totalorder %s1145_s17, %s1145_s17 }
   0x6   :  { %p1152_p3 = por %p1151_p2, %p1150_p1 }
   0x8   :  { %p1153_p4 = pnand %p1152_p3, %p1146_p0 }
   0xa   :  { %1156 = shalt.err (!%p1153_p4)
}
   0xb   :  { %s1182_s18 = smov 256   ;;  %s1183_s19 = smov 16  }
   0xc   :  { %28 = dma.hbm_to_vmem [thread:$0]  %s1522_s3, 2048, %s23_s16, [#allocation4], %s1182_s18, %s1182_s18, %s1183_s19  }
   0xd   :  { %1177 = dma.done.wait [#allocation4], 2048  }
   0xe   :  { %1178 = vsyncadd [#allocation4], 4294965248  ;;  %vm56_vm0 = vcmask 261120   ;;  %v55_v0 = vld [vmem:[%s1521_s2 + $0x18] sm:$0xff]  ;;  %v54_v1 = vld [vmem:[%s1521_s2 + $0x10] sm:$0xff]  ;;  %vm443_vm1 = vcmask 523264  }
   0xf   :  { %1012 = vmatprep.subr.mxu0 %v55_v0  ;;  %v36_v2 = vld [vmem:[%s1519_s0] sm:$0xff]  ;;  %v53_v3 = vld [vmem:[%s1521_s2 + $0x8] sm:$0xff]  ;;  %v38_v6 = vld [vmem:[%s1519_s0 + $0x10] sm:$0xff] }
  0x10   :  { %1013 = vmatpush3.msra.mxu0 %v55_v0  ;;  %1020 = vmatprep.mubr.msk.f32.mxu0 %vm56_vm0, %v36_v2  ;;  %v52_v4 = vld [vmem:[%s1521_s2] sm:$0xff]  ;;  %v37_v5 = vld [vmem:[%s1519_s0 + $0x8] sm:$0xff]  ;;  %v39_v7 = vld [vmem:[%s1519_s0 + $0x18] sm:$0xff] }
  0x11   :  { %1014 = vmatprep.subr.mxu0 %v54_v1  ;;  %v40_v8 = vld [vmem:[%s1519_s0 + $0x20] sm:$0xff]  ;;  %v41_v9 = vld [vmem:[%s1519_s0 + $0x28] sm:$0xff]  ;;  %v42_v10 = vld [vmem:[%s1519_s0 + $0x30] sm:$0xff] }
  0x12   :  { %1015 = vmatpush3.msra.mxu0 %v54_v1  ;;  %v43_v11 = vld [vmem:[%s1519_s0 + $0x38] sm:$0xff]  ;;  %v44_v12 = vld [vmem:[%s1519_s0 + $0x40] sm:$0xff]  ;;  %v45_v13 = vld [vmem:[%s1519_s0 + $0x48] sm:$0xff] }
  0x13   :  { %1016 = vmatprep.subr.mxu0 %v53_v3  ;;  %v46_v14 = vld [vmem:[%s1519_s0 + $0x50] sm:$0xff]  ;;  %v47_v15 = vld [vmem:[%s1519_s0 + $0x58] sm:$0xff]  ;;  %v48_v16 = vld [vmem:[%s1519_s0 + $0x60] sm:$0xff] }
  0x14   :  { %1017 = vmatpush3.msra.mxu0 %v53_v3  ;;  %v49_v17 = vld [vmem:[%s1519_s0 + $0x68] sm:$0xff]  ;;  %v50_v18 = vld [vmem:[%s1519_s0 + $0x70] sm:$0xff]  ;;  %v51_v19 = vld [vmem:[%s1519_s0 + $0x78] sm:$0xff] }
  0x15   :  { %1018 = vmatprep.subr.mxu0 %v52_v4  ;;  %v1296_v20 = vld [vmem:[%s1520_s1] sm:$0xff]  ;;  %v491_v21 = vld [vmem:[#allocation3 + $0x78] sm:$0xff]  ;;  %v490_v22 = vld [vmem:[#allocation3 + $0x70] sm:$0xff] }
  0x16   :  { %1019 = vmatpush3.msra.mxu0 %v52_v4  ;;  %1076 = vmatprep.mubr.f32.mxu1 %v1296_v20  ;;  %v489_v23 = vld [vmem:[#allocation3 + $0x68] sm:$0xff]  ;;  %v488_v24 = vld [vmem:[#allocation3 + $0x60] sm:$0xff]  ;;  %v487_v25 = vld [vmem:[#allocation3 + $0x58] sm:$0xff]  ;;  %v1184_v4 = vmov 0.0  }
  0x17   :  { %1021 = vmatmul.mubr.msk.f32.vlgmr.msra.gmra.mxu0 %vm56_vm0, %v37_v5  ;;  %557 = vmatprep.subr.mxu0 %v491_v21  ;;  %v486_v26 = vld [vmem:[#allocation3 + $0x50] sm:$0xff]  ;;  %v485_v27 = vld [vmem:[#allocation3 + $0x48] sm:$0xff]  ;;  %v484_v28 = vld [vmem:[#allocation3 + $0x40] sm:$0xff] }
  0x18   :  { %1023 = vmatprep.mubr.msk.f32.mxu0 %vm56_vm0, %v38_v6  ;;  %558 = vmatpush1.msra.mxu0 %v490_v22  ;;  %v483_v29 = vld [vmem:[#allocation3 + $0x38] sm:$0xff]  ;;  %v1302_v46 = vld [vmem:[%s1520_s1 + $0x8] sm:$0xff]  ;;  %v1307_v47 = vld [vmem:[%s1520_s1 + $0x10] sm:$0xff] }
  0x19   :  { %559 = vmatprep.subr.mxu0 %v489_v23  ;;  %v1314_v48 = vld [vmem:[%s1520_s1 + $0x18] sm:$0xff]  ;;  %v1319_v49 = vld [vmem:[%s1520_s1 + $0x20] sm:$0xff]  ;;  %v1326_v50 = vld [vmem:[%s1520_s1 + $0x28] sm:$0xff] }
  0x1a   :  { %560 = vmatpush1.msra.mxu0 %v488_v24  ;;  %v1331_v51 = vld [vmem:[%s1520_s1 + $0x30] sm:$0xff]  ;;  %v1338_v52 = vld [vmem:[%s1520_s1 + $0x38] sm:$0xff]  ;;  %v1343_v53 = vld [vmem:[%s1520_s1 + $0x40] sm:$0xff] }
  0x1b   :  { %1024 = vmatmul.mubr.msk.f32.gmra.mxu0 %vm56_vm0, %v39_v7  ;;  %561 = vmatprep.subr.mxu0 %v487_v25  ;;  %v1350_v54 = vld [vmem:[%s1520_s1 + $0x48] sm:$0xff]  ;;  %v1355_v55 = vld [vmem:[%s1520_s1 + $0x50] sm:$0xff]  ;;  %v1362_v56 = vld [vmem:[%s1520_s1 + $0x58] sm:$0xff] }
  0x1c   :  { %1026 = vmatprep.mubr.msk.f32.mxu0 %vm56_vm0, %v40_v8  ;;  %562 = vmatpush1.msra.mxu0 %v486_v26  ;;  %v1367_v57 = vld [vmem:[%s1520_s1 + $0x60] sm:$0xff]  ;;  %v1374_v58 = vld [vmem:[%s1520_s1 + $0x68] sm:$0xff]  ;;  %v1379_v59 = vld [vmem:[%s1520_s1 + $0x70] sm:$0xff] }
  0x1d   :  { %563 = vmatprep.subr.mxu0 %v485_v27  ;;  %v1386_v60 = vld [vmem:[%s1520_s1 + $0x78] sm:$0xff]  ;;  %v482_v61 = vld [vmem:[#allocation3 + $0x30] sm:$0xff]  ;;  %v481_v62 = vld [vmem:[#allocation3 + $0x28] sm:$0xff]  ;;  %s1185_s1 = smov [#allocation6]  }
  0x1e   :  { %564 = vmatpush1.msra.mxu0 %v484_v28  ;;  %v480_v63 = vld [vmem:[#allocation3 + $0x20] sm:$0xff]  ;;  %v479_v0 = vld [vmem:[#allocation3 + $0x18] sm:$0xff]  ;;  %v478_v1 = vld [vmem:[#allocation3 + $0x10] sm:$0xff]  ;;  %s916_s12 = sshll.u32 %s1185_s1, 4  ;;  %s917_s12 = int_to_ptr.vmem [resolvable:$true] %s916_s12 }
  0x1f   :  { %1027 = vmatmul.mubr.msk.f32.gmra.mxu0 %vm56_vm0, %v41_v9  ;;  %565 = vmatprep.subr.mxu0 %v483_v29  ;;  %v477_v2 = vld [vmem:[#allocation3 + $0x8] sm:$0xff]  ;;  %v476_v3 = vld [vmem:[#allocation3] sm:$0xff]  ;;  %s1157_s13 = scalar_lea.vmem %s917_s12, 4096  ;;  %p1162_p6 = scmp.lt.s32.totalorder %s917_s12, %s917_s12 }
  0x20   :  { %1029 = vmatprep.mubr.msk.f32.mxu0 %vm56_vm0, %v42_v10  ;;  %566 = vmatpush1.msra.mxu0 %v482_v61  ;;  %p1158_p5 = scmp.ne.s32.totalorder %s917_s12, %s1157_s13  ;;  %p1163_p7 = scmp.lt.s32.totalorder %s1157_s13, %s1157_s13 }
  0x21   :  { %567 = vmatprep.subr.mxu0 %v481_v62 }
  0x22   :  { %568 = vmatpush1.msra.mxu0 %v480_v63  ;;  %p1164_p8 = por %p1163_p7, %p1162_p6 }
  0x23   :  { %1030 = vmatmul.mubr.msk.f32.gmra.mxu0 %vm56_vm0, %v43_v11  ;;  %569 = vmatprep.subr.mxu0 %v479_v0 }
  0x24   :  { %1032 = vmatprep.mubr.msk.f32.mxu0 %vm56_vm0, %v44_v12  ;;  %570 = vmatpush1.msra.mxu0 %v478_v1  ;;  %p1165_p9 = pnand %p1164_p8, %p1158_p5 }
  0x25   :  { %571 = vmatprep.subr.mxu0 %v477_v2 }
  0x26   :  { %572 = vmatpush1.msra.mxu0 %v476_v3 }
  0x27   :  { %1033 = vmatmul.mubr.msk.f32.gmra.mxu0 %vm56_vm0, %v45_v13 }
  0x28   :  { %1035 = vmatprep.mubr.msk.f32.mxu0 %vm56_vm0, %v46_v14 }
  0x2b   :  { %1036 = vmatmul.mubr.msk.f32.gmra.mxu0 %vm56_vm0, %v47_v15 }
  0x2c   :  { %1038 = vmatprep.mubr.msk.f32.mxu0 %vm56_vm0, %v48_v16 }
  0x2f   :  { %1039 = vmatmul.mubr.msk.f32.gmra.mxu0 %vm56_vm0, %v49_v17 }
  0x30   :  { %1041 = vmatprep.mubr.msk.f32.mxu0 %vm56_vm0, %v50_v18 }
  0x33   :  { %1042 = vmatmul.mubr.msk.f32.gmra.mxu0 %vm56_vm0, %v51_v19 }
  0x34   :  { %605 = vmatprep.mubr.f32.mxu0 %v1184_v4 }
  0xd7   :  { %v1022_v30 = vpop.f32.mrf.mxu0 }
  0xd9   :  { %v171_v31 = vpop.f32.mrf.mxu0 }
  0xdb   :  { %v1025_v32 = vpop.f32.mrf.mxu0 }
  0xdd   :  { %v181_v33 = vpop.f32.mrf.mxu0 }
  0xdf   :  { %v1028_v34 = vpop.f32.mrf.mxu0 }
  0xe1   :  { %v191_v35 = vpop.f32.mrf.mxu0 }
  0xe3   :  { %v1031_v36 = vpop.f32.mrf.mxu0 }
  0xe5   :  { %v201_v37 = vpop.f32.mrf.mxu0 }
  0xe7   :  { %v1034_v38 = vpop.f32.mrf.mxu0 }
  0xe9   :  { %v211_v39 = vpop.f32.mrf.mxu0 }
  0xeb   :  { %v1037_v40 = vpop.f32.mrf.mxu0 }
  0xed   :  { %v221_v41 = vpop.f32.mrf.mxu0 }
  0xef   :  { %v1040_v42 = vpop.f32.mrf.mxu0 }
  0xf1   :  { %v231_v43 = vpop.f32.mrf.mxu0 }
  0xf3   :  { %v1043_v44 = vpop.f32.mrf.mxu0 }
  0xf4   :  { %1044 = vmatprep.subr.mxu1 %v1043_v44 }
  0xf5   :  { %v241_v45 = vpop.f32.mrf.mxu0  ;;  %1045 = vmatpush3.msra.mxu1 %v1043_v44 }
  0xf6   :  { %1046 = vmatprep.subr.mxu1 %v241_v45 }
  0xf7   :  { %1047 = vmatpush3.msra.mxu1 %v241_v45 }
  0xf8   :  { %1048 = vmatprep.subr.mxu1 %v1040_v42 }
  0xf9   :  { %1049 = vmatpush3.msra.mxu1 %v1040_v42 }
  0xfa   :  { %1050 = vmatprep.subr.mxu1 %v231_v43 }
  0xfb   :  { %1051 = vmatpush3.msra.mxu1 %v231_v43 }
  0xfc   :  { %1052 = vmatprep.subr.mxu1 %v1037_v40 }
  0xfd   :  { %1053 = vmatpush3.msra.mxu1 %v1037_v40 }
  0xfe   :  { %1054 = vmatprep.subr.mxu1 %v221_v41 }
  0xff   :  { %1055 = vmatpush3.msra.mxu1 %v221_v41 }
 0x100   :  { %1056 = vmatprep.subr.mxu1 %v1034_v38 }
 0x101   :  { %1057 = vmatpush3.msra.mxu1 %v1034_v38 }
 0x102   :  { %1058 = vmatprep.subr.mxu1 %v211_v39 }
 0x103   :  { %1059 = vmatpush3.msra.mxu1 %v211_v39 }
 0x104   :  { %1060 = vmatprep.subr.mxu1 %v1031_v36 }
 0x105   :  { %1061 = vmatpush3.msra.mxu1 %v1031_v36 }
 0x106   :  { %1062 = vmatprep.subr.mxu1 %v201_v37 }
 0x107   :  { %1063 = vmatpush3.msra.mxu1 %v201_v37 }
 0x108   :  { %1064 = vmatprep.subr.mxu1 %v1028_v34 }
 0x109   :  { %1065 = vmatpush3.msra.mxu1 %v1028_v34 }
 0x10a   :  { %1066 = vmatprep.subr.mxu1 %v191_v35 }
 0x10b   :  { %1067 = vmatpush3.msra.mxu1 %v191_v35 }
 0x10c   :  { %1068 = vmatprep.subr.mxu1 %v1025_v32 }
 0x10d   :  { %1069 = vmatpush3.msra.mxu1 %v1025_v32 }
 0x10e   :  { %1070 = vmatprep.subr.mxu1 %v181_v33 }
 0x10f   :  { %1071 = vmatpush3.msra.mxu1 %v181_v33 }
 0x110   :  { %1072 = vmatprep.subr.mxu1 %v1022_v30 }
 0x111   :  { %1073 = vmatpush3.msra.mxu1 %v1022_v30 }
 0x112   :  { %1074 = vmatprep.subr.mxu1 %v171_v31 }
 0x113   :  { %1075 = vmatpush3.msra.mxu1 %v171_v31 }
 0x114   :  { %1077 = vmatmul.mubr.f32.vlgmr.msra.gmra.mxu1 %v1302_v46 }
 0x115   :  { %1079 = vmatprep.mubr.f32.mxu1 %v1307_v47 }
 0x118   :  { %1080 = vmatmul.mubr.f32.gmra.mxu1 %v1314_v48 }
 0x119   :  { %1082 = vmatprep.mubr.f32.mxu1 %v1319_v49 }
 0x11c   :  { %1083 = vmatmul.mubr.f32.gmra.mxu1 %v1326_v50 }
 0x11d   :  { %1085 = vmatprep.mubr.f32.mxu1 %v1331_v51 }
 0x120   :  { %1086 = vmatmul.mubr.f32.gmra.mxu1 %v1338_v52 }
 0x121   :  { %1088 = vmatprep.mubr.f32.mxu1 %v1343_v53 }
 0x124   :  { %1089 = vmatmul.mubr.f32.gmra.mxu1 %v1350_v54 }
 0x125   :  { %1091 = vmatprep.mubr.f32.mxu1 %v1355_v55 }
 0x128   :  { %1092 = vmatmul.mubr.f32.gmra.mxu1 %v1362_v56 }
 0x129   :  { %1094 = vmatprep.mubr.f32.mxu1 %v1367_v57 }
 0x12c   :  { %1095 = vmatmul.mubr.f32.gmra.mxu1 %v1374_v58 }
 0x12d   :  { %1097 = vmatprep.mubr.f32.mxu1 %v1379_v59 }
 0x130   :  { %1098 = vmatmul.mubr.f32.gmra.mxu1 %v1386_v60 }
 0x131   :  { %800 = vmatprep.mubr.f32.mxu1 %v1184_v4 }
 0x1d4   :  { %v1078_v5 = vpop.f32.mrf.mxu1 }
 0x1d5   :  { %v412_v6 = vmul.f32 0.2, %v1078_v5 }
 0x1d6   :  { %v332_v7 = vpop.f32.mrf.mxu1 }
 0x1d7   :  { %v428_v8 = vmax.f32 %v1078_v5, %v412_v6  ;;  %v411_v9 = vmul.f32 0.2, %v332_v7 }
 0x1d8   :  { %v1081_v10 = vpop.f32.mrf.mxu1 }
 0x1d9   :  { %445 = vst.msk [vmem:[#allocation2 + $0x8] sm:$0xff] %vm443_vm1, %v428_v8  ;;  %v427_v11 = vmax.f32 %v332_v7, %v411_v9  ;;  %v414_v12 = vmul.f32 0.2, %v1081_v10 }
 0x1da   :  { %v342_v13 = vpop.f32.mrf.mxu1 }
 0x1db   :  { %444 = vst.msk [vmem:[#allocation2] sm:$0xff] %vm443_vm1, %v427_v11  ;;  %v430_v14 = vmax.f32 %v1081_v10, %v414_v12  ;;  %v413_v15 = vmul.f32 0.2, %v342_v13 }
 0x1dc   :  { %v1084_v16 = vpop.f32.mrf.mxu1 }
 0x1dd   :  { %447 = vst.msk [vmem:[#allocation2 + $0x18] sm:$0xff] %vm443_vm1, %v430_v14  ;;  %v429_v17 = vmax.f32 %v342_v13, %v413_v15  ;;  %v416_v18 = vmul.f32 0.2, %v1084_v16 }
 0x1de   :  { %v352_v19 = vpop.f32.mrf.mxu1 }
 0x1df   :  { %446 = vst.msk [vmem:[#allocation2 + $0x10] sm:$0xff] %vm443_vm1, %v429_v17  ;;  %v432_v21 = vmax.f32 %v1084_v16, %v416_v18  ;;  %v415_v22 = vmul.f32 0.2, %v352_v19 }
 0x1e0   :  { %v1087_v23 = vpop.f32.mrf.mxu1  ;;  %v461_v33 = vld [vmem:[#allocation2 + $0x8] sm:$0xff] }
 0x1e1   :  { %449 = vst.msk [vmem:[#allocation2 + $0x28] sm:$0xff] %vm443_vm1, %v432_v21  ;;  %v431_v24 = vmax.f32 %v352_v19, %v415_v22  ;;  %v418_v25 = vmul.f32 0.2, %v1087_v23 }
 0x1e2   :  { %v460_v26 = vld [vmem:[#allocation2] sm:$0xff]  ;;  %v362_v27 = vpop.f32.mrf.mxu1 }
 0x1e3   :  { %448 = vst.msk [vmem:[#allocation2 + $0x20] sm:$0xff] %vm443_vm1, %v431_v24  ;;  %944 = vmatmul.mubr.msk.f32.vlgmr.msra.gmra.mxu0 %vm443_vm1, %v460_v26  ;;  %v434_v28 = vmax.f32 %v1087_v23, %v418_v25  ;;  %v417_v29 = vmul.f32 0.2, %v362_v27 }
 0x1e4   :  { %611 = vmatprep.mubr.f32.mxu0 %v1184_v4  ;;  %v1090_v30 = vpop.f32.mrf.mxu1  ;;  %v463_v62 = vld [vmem:[#allocation2 + $0x18] sm:$0xff] }
 0x1e5   :  { %451 = vst.msk [vmem:[#allocation2 + $0x38] sm:$0xff] %vm443_vm1, %v434_v28  ;;  %v433_v31 = vmax.f32 %v362_v27, %v417_v29  ;;  %v420_v32 = vmul.f32 0.2, %v1090_v30 }
 0x1e6   :  { %v372_v34 = vpop.f32.mrf.mxu1  ;;  %v462_v40 = vld [vmem:[#allocation2 + $0x10] sm:$0xff] }
 0x1e7   :  { %945 = vmatmul.mubr.msk.f32.gmra.mxu0 %vm443_vm1, %v461_v33  ;;  %450 = vst.msk [vmem:[#allocation2 + $0x30] sm:$0xff] %vm443_vm1, %v433_v31  ;;  %v436_v35 = vmax.f32 %v1090_v30, %v420_v32  ;;  %v419_v36 = vmul.f32 0.2, %v372_v34 }
 0x1e8   :  { %617 = vmatprep.mubr.f32.mxu0 %v1184_v4  ;;  %v1093_v37 = vpop.f32.mrf.mxu1  ;;  %v465_v11 = vld [vmem:[#allocation2 + $0x28] sm:$0xff] }
 0x1e9   :  { %453 = vst.msk [vmem:[#allocation2 + $0x48] sm:$0xff] %vm443_vm1, %v436_v35  ;;  %v435_v38 = vmax.f32 %v372_v34, %v419_v36  ;;  %v422_v39 = vmul.f32 0.2, %v1093_v37 }
 0x1ea   :  { %v382_v41 = vpop.f32.mrf.mxu1  ;;  %v464_v6 = vld [vmem:[#allocation2 + $0x20] sm:$0xff] }
 0x1eb   :  { %946 = vmatmul.mubr.msk.f32.gmra.mxu0 %vm443_vm1, %v462_v40  ;;  %452 = vst.msk [vmem:[#allocation2 + $0x40] sm:$0xff] %vm443_vm1, %v435_v38  ;;  %v438_v42 = vmax.f32 %v1093_v37, %v422_v39  ;;  %v421_v43 = vmul.f32 0.2, %v382_v41 }
 0x1ec   :  { %623 = vmatprep.mubr.f32.mxu0 %v1184_v4  ;;  %v1096_v44 = vpop.f32.mrf.mxu1  ;;  %v467_v13 = vld [vmem:[#allocation2 + $0x38] sm:$0xff] }
 0x1ed   :  { %455 = vst.msk [vmem:[#allocation2 + $0x58] sm:$0xff] %vm443_vm1, %v438_v42  ;;  %v437_v45 = vmax.f32 %v382_v41, %v421_v43  ;;  %v424_v61 = vmul.f32 0.2, %v1096_v44 }
 0x1ee   :  { %v392_v63 = vpop.f32.mrf.mxu1  ;;  %v466_v12 = vld [vmem:[#allocation2 + $0x30] sm:$0xff] }
 0x1ef   :  { %947 = vmatmul.mubr.msk.f32.gmra.mxu0 %vm443_vm1, %v463_v62  ;;  %454 = vst.msk [vmem:[#allocation2 + $0x50] sm:$0xff] %vm443_vm1, %v437_v45  ;;  %v440_v0 = vmax.f32 %v1096_v44, %v424_v61  ;;  %v423_v1 = vmul.f32 0.2, %v392_v63 }
 0x1f0   :  { %629 = vmatprep.mubr.f32.mxu0 %v1184_v4  ;;  %v1099_v2 = vpop.f32.mrf.mxu1  ;;  %v469_v15 = vld [vmem:[#allocation2 + $0x48] sm:$0xff] }
 0x1f1   :  { %457 = vst.msk [vmem:[#allocation2 + $0x68] sm:$0xff] %vm443_vm1, %v440_v0  ;;  %v439_v3 = vmax.f32 %v392_v63, %v423_v1  ;;  %v426_v5 = vmul.f32 0.2, %v1099_v2 }
 0x1f2   :  { %v402_v7 = vpop.f32.mrf.mxu1  ;;  %v468_v14 = vld [vmem:[#allocation2 + $0x40] sm:$0xff] }
 0x1f3   :  { %948 = vmatmul.mubr.msk.f32.gmra.mxu0 %vm443_vm1, %v464_v6  ;;  %456 = vst.msk [vmem:[#allocation2 + $0x60] sm:$0xff] %vm443_vm1, %v439_v3  ;;  %v442_v8 = vmax.f32 %v1099_v2, %v426_v5  ;;  %v425_v9 = vmul.f32 0.2, %v402_v7 }
 0x1f4   :  { %635 = vmatprep.mubr.f32.mxu0 %v1184_v4  ;;  %v471_v17 = vld [vmem:[#allocation2 + $0x58] sm:$0xff] }
 0x1f5   :  { %459 = vst.msk [vmem:[#allocation2 + $0x78] sm:$0xff] %vm443_vm1, %v442_v8  ;;  %v441_v10 = vmax.f32 %v402_v7, %v425_v9 }
 0x1f6   :  { %v470_v16 = vld [vmem:[#allocation2 + $0x50] sm:$0xff] }
 0x1f7   :  { %949 = vmatmul.mubr.msk.f32.gmra.mxu0 %vm443_vm1, %v465_v11  ;;  %458 = vst.msk [vmem:[#allocation2 + $0x70] sm:$0xff] %vm443_vm1, %v441_v10 }
 0x1f8   :  { %641 = vmatprep.mubr.f32.mxu0 %v1184_v4  ;;  %v473_v19 = vld [vmem:[#allocation2 + $0x68] sm:$0xff] }
 0x1fa   :  { %v472_v18 = vld [vmem:[#allocation2 + $0x60] sm:$0xff] }
 0x1fb   :  { %950 = vmatmul.mubr.msk.f32.gmra.mxu0 %vm443_vm1, %v466_v12 }
 0x1fc   :  { %647 = vmatprep.mubr.f32.mxu0 %v1184_v4  ;;  %v475_v22 = vld [vmem:[#allocation2 + $0x78] sm:$0xff] }
 0x1fe   :  { %v474_v21 = vld [vmem:[#allocation2 + $0x70] sm:$0xff] }
 0x1ff   :  { %951 = vmatmul.mubr.msk.f32.gmra.mxu0 %vm443_vm1, %v467_v13 }
 0x200   :  { %653 = vmatprep.mubr.f32.mxu0 %v1184_v4 }
 0x203   :  { %952 = vmatmul.mubr.msk.f32.gmra.mxu0 %vm443_vm1, %v468_v14 }
 0x204   :  { %659 = vmatprep.mubr.f32.mxu0 %v1184_v4 }
 0x207   :  { %953 = vmatmul.mubr.msk.f32.gmra.mxu0 %vm443_vm1, %v469_v15 }
 0x208   :  { %665 = vmatprep.mubr.f32.mxu0 %v1184_v4 }
 0x20b   :  { %954 = vmatmul.mubr.msk.f32.gmra.mxu0 %vm443_vm1, %v470_v16 }
 0x20c   :  { %671 = vmatprep.mubr.f32.mxu0 %v1184_v4 }
 0x20f   :  { %955 = vmatmul.mubr.msk.f32.gmra.mxu0 %vm443_vm1, %v471_v17 }
 0x210   :  { %677 = vmatprep.mubr.f32.mxu0 %v1184_v4 }
 0x213   :  { %956 = vmatmul.mubr.msk.f32.gmra.mxu0 %vm443_vm1, %v472_v18 }
 0x214   :  { %683 = vmatprep.mubr.f32.mxu0 %v1184_v4 }
 0x217   :  { %957 = vmatmul.mubr.msk.f32.gmra.mxu0 %vm443_vm1, %v473_v19 }
 0x218   :  { %689 = vmatprep.mubr.f32.mxu0 %v1184_v4 }
 0x21b   :  { %958 = vmatmul.mubr.msk.f32.gmra.mxu0 %vm443_vm1, %v474_v21 }
 0x21c   :  { %695 = vmatprep.mubr.f32.mxu0 %v1184_v4 }
 0x21f   :  { %959 = vmatmul.mubr.msk.f32.gmra.mxu0 %vm443_vm1, %v475_v22 }
 0x220   :  { %782 = vmatprep.mubr.f32.mxu0 %v1184_v4 }
 0x2a3   :  { %v1439_v23 = vpop.f32.mrf.mxu0 }
 0x2a5   :  { %v1441_v24 = vpop.f32.mrf.mxu0 }
 0x2a7   :  { %v1443_v25 = vpop.f32.mrf.mxu0 }
 0x2a9   :  { %v1445_v26 = vpop.f32.mrf.mxu0 }
 0x2ab   :  { %v1447_v27 = vpop.f32.mrf.mxu0 }
 0x2ad   :  { %v1449_v28 = vpop.f32.mrf.mxu0 }
 0x2af   :  { %v1451_v29 = vpop.f32.mrf.mxu0 }
 0x2b1   :  { %v1453_v30 = vpop.f32.mrf.mxu0 }
 0x2b3   :  { %v1455_v31 = vpop.f32.mrf.mxu0 }
 0x2b5   :  { %v1457_v32 = vpop.f32.mrf.mxu0 }
 0x2b7   :  { %v1459_v33 = vpop.f32.mrf.mxu0 }
 0x2b9   :  { %v639_v34 = vpop.f32.mrf.mxu0 }
 0x2bb   :  { %v643_v35 = vpop.f32.mrf.mxu0 }
 0x2bd   :  { %v645_v36 = vpop.f32.mrf.mxu0 }
 0x2bf   :  { %v649_v37 = vpop.f32.mrf.mxu0 }
 0x2c1   :  { %v651_v38 = vpop.f32.mrf.mxu0 }
 0x2c3   :  { %v655_v39 = vpop.f32.mrf.mxu0 }
 0x2c5   :  { %v657_v40 = vpop.f32.mrf.mxu0 }
 0x2c7   :  { %v661_v41 = vpop.f32.mrf.mxu0 }
 0x2c9   :  { %v663_v42 = vpop.f32.mrf.mxu0 }
 0x2cb   :  { %v667_v43 = vpop.f32.mrf.mxu0 }
 0x2cd   :  { %v669_v44 = vpop.f32.mrf.mxu0 }
 0x2cf   :  { %v673_v45 = vpop.f32.mrf.mxu0 }
 0x2d1   :  { %v675_v61 = vpop.f32.mrf.mxu0 }
 0x2d3   :  { %v679_v62 = vpop.f32.mrf.mxu0 }
 0x2d5   :  { %v681_v63 = vpop.f32.mrf.mxu0 }
 0x2d7   :  { %v685_v0 = vpop.f32.mrf.mxu0 }
 0x2d9   :  { %v687_v1 = vpop.f32.mrf.mxu0 }
 0x2db   :  { %v691_v2 = vpop.f32.mrf.mxu0 }
 0x2dd   :  { %v693_v3 = vpop.f32.mrf.mxu0 }
 0x2df   :  { %v697_v5 = vpop.f32.mrf.mxu0 }
 0x2e1   :  { %v699_v6 = vpop.f32.mrf.mxu0 }
 0x2e2   :  { %718 = vmatprep.subr.mxu0 %v699_v6  ;;  %1100 = vmatprep.subr.mxu1 %v699_v6 }
 0x2e3   :  { %719 = vmatpush1.msra.mxu0 %v697_v5  ;;  %1116 = vmatpush1.msra.mxu1 %v697_v5 }
 0x2e4   :  { %720 = vmatprep.subr.mxu0 %v693_v3  ;;  %1101 = vmatprep.subr.mxu1 %v693_v3 }
 0x2e5   :  { %721 = vmatpush1.msra.mxu0 %v691_v2  ;;  %1117 = vmatpush1.msra.mxu1 %v691_v2 }
 0x2e6   :  { %722 = vmatprep.subr.mxu0 %v687_v1  ;;  %1102 = vmatprep.subr.mxu1 %v687_v1 }
 0x2e7   :  { %723 = vmatpush1.msra.mxu0 %v685_v0  ;;  %1118 = vmatpush1.msra.mxu1 %v685_v0 }
 0x2e8   :  { %724 = vmatprep.subr.mxu0 %v681_v63  ;;  %1103 = vmatprep.subr.mxu1 %v681_v63 }
 0x2e9   :  { %725 = vmatpush1.msra.mxu0 %v679_v62  ;;  %1119 = vmatpush1.msra.mxu1 %v679_v62 }
 0x2ea   :  { %726 = vmatprep.subr.mxu0 %v675_v61  ;;  %1104 = vmatprep.subr.mxu1 %v675_v61 }
 0x2eb   :  { %727 = vmatpush1.msra.mxu0 %v673_v45  ;;  %1120 = vmatpush1.msra.mxu1 %v673_v45 }
 0x2ec   :  { %728 = vmatprep.subr.mxu0 %v669_v44  ;;  %1105 = vmatprep.subr.mxu1 %v669_v44 }
 0x2ed   :  { %729 = vmatpush1.msra.mxu0 %v667_v43  ;;  %1121 = vmatpush1.msra.mxu1 %v667_v43 }
 0x2ee   :  { %730 = vmatprep.subr.mxu0 %v663_v42  ;;  %1106 = vmatprep.subr.mxu1 %v663_v42 }
 0x2ef   :  { %731 = vmatpush1.msra.mxu0 %v661_v41  ;;  %1122 = vmatpush1.msra.mxu1 %v661_v41 }
 0x2f0   :  { %732 = vmatprep.subr.mxu0 %v657_v40  ;;  %1107 = vmatprep.subr.mxu1 %v657_v40 }
 0x2f1   :  { %733 = vmatpush1.msra.mxu0 %v655_v39  ;;  %1123 = vmatpush1.msra.mxu1 %v655_v39 }
 0x2f2   :  { %734 = vmatprep.subr.mxu0 %v651_v38  ;;  %1108 = vmatprep.subr.mxu1 %v651_v38 }
 0x2f3   :  { %735 = vmatpush1.msra.mxu0 %v649_v37  ;;  %1124 = vmatpush1.msra.mxu1 %v649_v37 }
 0x2f4   :  { %736 = vmatprep.subr.mxu0 %v645_v36  ;;  %1109 = vmatprep.subr.mxu1 %v645_v36 }
 0x2f5   :  { %737 = vmatpush1.msra.mxu0 %v643_v35  ;;  %1125 = vmatpush1.msra.mxu1 %v643_v35 }
 0x2f6   :  { %738 = vmatprep.subr.mxu0 %v639_v34  ;;  %1110 = vmatprep.subr.mxu1 %v639_v34 }
 0x2f7   :  { %739 = vmatpush1.msra.mxu0 %v1459_v33  ;;  %1126 = vmatpush1.msra.mxu1 %v1459_v33 }
 0x2f8   :  { %740 = vmatprep.subr.mxu0 %v1457_v32  ;;  %1111 = vmatprep.subr.mxu1 %v1457_v32 }
 0x2f9   :  { %741 = vmatpush1.msra.mxu0 %v1455_v31  ;;  %1127 = vmatpush1.msra.mxu1 %v1455_v31 }
 0x2fa   :  { %742 = vmatprep.subr.mxu0 %v1453_v30  ;;  %1112 = vmatprep.subr.mxu1 %v1453_v30 }
 0x2fb   :  { %743 = vmatpush1.msra.mxu0 %v1451_v29  ;;  %1128 = vmatpush1.msra.mxu1 %v1451_v29 }
 0x2fc   :  { %744 = vmatprep.subr.mxu0 %v1449_v28  ;;  %1113 = vmatprep.subr.mxu1 %v1449_v28 }
 0x2fd   :  { %745 = vmatpush1.msra.mxu0 %v1447_v27  ;;  %1129 = vmatpush1.msra.mxu1 %v1447_v27 }
 0x2fe   :  { %746 = vmatprep.subr.mxu0 %v1445_v26  ;;  %1114 = vmatprep.subr.mxu1 %v1445_v26 }
 0x2ff   :  { %747 = vmatpush1.msra.mxu0 %v1443_v25  ;;  %1130 = vmatpush1.msra.mxu1 %v1443_v25 }
 0x300   :  { %748 = vmatprep.subr.mxu0 %v1441_v24  ;;  %1115 = vmatprep.subr.mxu1 %v1441_v24 }
 0x301   :  { %749 = vmatpush1.msra.mxu0 %v1439_v23  ;;  %1131 = vmatpush1.msra.mxu1 %v1439_v23 }
 0x302   :  { %801 = vmatmul.mubr.f32.vlgmr.msra.gmra.mxu1 %v1314_v48  ;;  %783 = vmatmul.mubr.f32.vlgmr.msra.gmra.mxu0 %v1296_v20 }
 0x303   :  { %806 = vmatprep.mubr.f32.mxu1 %v1184_v4  ;;  %788 = vmatprep.mubr.f32.mxu0 %v1184_v4 }
 0x306   :  { %807 = vmatmul.mubr.f32.gmra.mxu1 %v1319_v49  ;;  %789 = vmatmul.mubr.f32.gmra.mxu0 %v1302_v46 }
 0x307   :  { %812 = vmatprep.mubr.f32.mxu1 %v1184_v4  ;;  %794 = vmatprep.mubr.f32.mxu0 %v1184_v4 }
 0x30a   :  { %813 = vmatmul.mubr.f32.gmra.mxu1 %v1326_v50  ;;  %795 = vmatmul.mubr.f32.gmra.mxu0 %v1307_v47 }
 0x30b   :  { %818 = vmatprep.mubr.f32.mxu1 %v1184_v4 }
 0x30e   :  { %819 = vmatmul.mubr.f32.gmra.mxu1 %v1331_v51 }
 0x30f   :  { %824 = vmatprep.mubr.f32.mxu1 %v1184_v4 }
 0x312   :  { %825 = vmatmul.mubr.f32.gmra.mxu1 %v1338_v52 }
 0x313   :  { %830 = vmatprep.mubr.f32.mxu1 %v1184_v4 }
 0x316   :  { %831 = vmatmul.mubr.f32.gmra.mxu1 %v1343_v53 }
 0x317   :  { %836 = vmatprep.mubr.f32.mxu1 %v1184_v4 }
 0x31a   :  { %837 = vmatmul.mubr.f32.gmra.mxu1 %v1350_v54 }
 0x31b   :  { %842 = vmatprep.mubr.f32.mxu1 %v1184_v4 }
 0x31e   :  { %843 = vmatmul.mubr.f32.gmra.mxu1 %v1355_v55 }
 0x31f   :  { %848 = vmatprep.mubr.f32.mxu1 %v1184_v4 }
 0x322   :  { %849 = vmatmul.mubr.f32.gmra.mxu1 %v1362_v56 }
 0x323   :  { %854 = vmatprep.mubr.f32.mxu1 %v1184_v4 }
 0x326   :  { %855 = vmatmul.mubr.f32.gmra.mxu1 %v1367_v57 }
 0x327   :  { %860 = vmatprep.mubr.f32.mxu1 %v1184_v4 }
 0x32a   :  { %861 = vmatmul.mubr.f32.gmra.mxu1 %v1374_v58 }
 0x32b   :  { %866 = vmatprep.mubr.f32.mxu1 %v1184_v4 }
 0x32e   :  { %867 = vmatmul.mubr.f32.gmra.mxu1 %v1379_v59 }
 0x32f   :  { %872 = vmatprep.mubr.f32.mxu1 %v1184_v4 }
 0x332   :  { %873 = vmatmul.mubr.f32.gmra.mxu1 %v1386_v60 }
 0x3c2   :  { %v802_v20 = vpop.f32.mrf.mxu1  ;;  %v784_v46 = vpop.f32.mrf.mxu0 }
 0x3c3   :  { %885 = vst [vmem:[#allocation6 + $0x30] sm:$0xff] %v802_v20  ;;  %879 = vst [vmem:[#allocation6] sm:$0xff] %v784_v46 }
 0x3c4   :  { %v804_v47 = vpop.f32.mrf.mxu1  ;;  %v786_v48 = vpop.f32.mrf.mxu0 }
 0x3c5   :  { %886 = vst [vmem:[#allocation6 + $0x38] sm:$0xff] %v804_v47  ;;  %880 = vst [vmem:[#allocation6 + $0x8] sm:$0xff] %v786_v48 }
 0x3c6   :  { %v808_v49 = vpop.f32.mrf.mxu1  ;;  %v790_v50 = vpop.f32.mrf.mxu0 }
 0x3c7   :  { %887 = vst [vmem:[#allocation6 + $0x40] sm:$0xff] %v808_v49  ;;  %881 = vst [vmem:[#allocation6 + $0x10] sm:$0xff] %v790_v50 }
 0x3c8   :  { %v810_v51 = vpop.f32.mrf.mxu1  ;;  %v792_v52 = vpop.f32.mrf.mxu0 }
 0x3c9   :  { %888 = vst [vmem:[#allocation6 + $0x48] sm:$0xff] %v810_v51  ;;  %882 = vst [vmem:[#allocation6 + $0x18] sm:$0xff] %v792_v52 }
 0x3ca   :  { %v814_v53 = vpop.f32.mrf.mxu1  ;;  %v796_v54 = vpop.f32.mrf.mxu0 }
 0x3cb   :  { %889 = vst [vmem:[#allocation6 + $0x50] sm:$0xff] %v814_v53  ;;  %883 = vst [vmem:[#allocation6 + $0x20] sm:$0xff] %v796_v54 }
 0x3cc   :  { %v816_v55 = vpop.f32.mrf.mxu1  ;;  %v798_v56 = vpop.f32.mrf.mxu0 }
 0x3cd   :  { %890 = vst [vmem:[#allocation6 + $0x58] sm:$0xff] %v816_v55  ;;  %884 = vst [vmem:[#allocation6 + $0x28] sm:$0xff] %v798_v56 }
 0x3ce   :  { %v820_v57 = vpop.f32.mrf.mxu1 }
 0x3cf   :  { %891 = vst [vmem:[#allocation6 + $0x60] sm:$0xff] %v820_v57 }
 0x3d0   :  { %v822_v58 = vpop.f32.mrf.mxu1 }
 0x3d1   :  { %892 = vst [vmem:[#allocation6 + $0x68] sm:$0xff] %v822_v58 }
 0x3d2   :  { %v826_v59 = vpop.f32.mrf.mxu1 }
 0x3d3   :  { %893 = vst [vmem:[#allocation6 + $0x70] sm:$0xff] %v826_v59 }
 0x3d4   :  { %v828_v60 = vpop.f32.mrf.mxu1 }
 0x3d5   :  { %894 = vst [vmem:[#allocation6 + $0x78] sm:$0xff] %v828_v60 }
 0x3d6   :  { %v832_v4 = vpop.f32.mrf.mxu1 }
 0x3d7   :  { %895 = vst [vmem:[#allocation6 + $0x80] sm:$0xff] %v832_v4 }
 0x3d8   :  { %v834_v7 = vpop.f32.mrf.mxu1 }
 0x3d9   :  { %896 = vst [vmem:[#allocation6 + $0x88] sm:$0xff] %v834_v7 }
 0x3da   :  { %v838_v8 = vpop.f32.mrf.mxu1 }
 0x3db   :  { %897 = vst [vmem:[#allocation6 + $0x90] sm:$0xff] %v838_v8 }
 0x3dc   :  { %v840_v9 = vpop.f32.mrf.mxu1 }
 0x3dd   :  { %898 = vst [vmem:[#allocation6 + $0x98] sm:$0xff] %v840_v9 }
 0x3de   :  { %v844_v10 = vpop.f32.mrf.mxu1 }
 0x3df   :  { %899 = vst [vmem:[#allocation6 + $0xa0] sm:$0xff] %v844_v10 }
 0x3e0   :  { %v846_v11 = vpop.f32.mrf.mxu1 }
 0x3e1   :  { %900 = vst [vmem:[#allocation6 + $0xa8] sm:$0xff] %v846_v11 }
 0x3e2   :  { %v850_v12 = vpop.f32.mrf.mxu1 }
 0x3e3   :  { %901 = vst [vmem:[#allocation6 + $0xb0] sm:$0xff] %v850_v12 }
 0x3e4   :  { %v852_v13 = vpop.f32.mrf.mxu1 }
 0x3e5   :  { %902 = vst [vmem:[#allocation6 + $0xb8] sm:$0xff] %v852_v13 }
 0x3e6   :  { %v856_v14 = vpop.f32.mrf.mxu1 }
 0x3e7   :  { %903 = vst [vmem:[#allocation6 + $0xc0] sm:$0xff] %v856_v14 }
 0x3e8   :  { %v858_v15 = vpop.f32.mrf.mxu1 }
 0x3e9   :  { %904 = vst [vmem:[#allocation6 + $0xc8] sm:$0xff] %v858_v15 }
 0x3ea   :  { %v862_v16 = vpop.f32.mrf.mxu1 }
 0x3eb   :  { %905 = vst [vmem:[#allocation6 + $0xd0] sm:$0xff] %v862_v16 }
 0x3ec   :  { %v864_v17 = vpop.f32.mrf.mxu1 }
 0x3ed   :  { %906 = vst [vmem:[#allocation6 + $0xd8] sm:$0xff] %v864_v17 }
 0x3ee   :  { %v868_v18 = vpop.f32.mrf.mxu1 }
 0x3ef   :  { %907 = vst [vmem:[#allocation6 + $0xe0] sm:$0xff] %v868_v18 }
 0x3f0   :  { %v870_v19 = vpop.f32.mrf.mxu1 }
 0x3f1   :  { %908 = vst [vmem:[#allocation6 + $0xe8] sm:$0xff] %v870_v19 }
 0x3f2   :  { %v874_v21 = vpop.f32.mrf.mxu1 }
 0x3f3   :  { %909 = vst [vmem:[#allocation6 + $0xf0] sm:$0xff] %v874_v21 }
 0x3f4   :  { %v876_v22 = vpop.f32.mrf.mxu1 }
 0x3f5   :  { %910 = vst [vmem:[#allocation6 + $0xf8] sm:$0xff] %v876_v22 }
 0x3f6   :  { %1168 = shalt.err (!%p1165_p9)
}
 0x3f7   :  { %922 = dma.vmem_to_hbm [thread:$0]  %s917_s12, 4096, %s1523_s4, [#allocation5], %s1182_s18, %s1182_s18, %s1183_s19  }
 0x3f8   :  { %1179 = dma.done.wait [#allocation5], 4096  }
 0x3f9   :  { %1180 = vsyncadd [#allocation5], 4294963200 }
 0x3fa   :  { %926 = vsyncpa [#allocation4], 1 }
 0x3fb   :  { %927 = vsyncpa [#allocation5], 1 }

</bundles_post_ra>
